<compile_context>
chip_gen: v7x
topology: tpu7x:2x2x1
jax: 0.10.0
libtpu: 0.0.40
codegen_flags: <defaults>
</compile_context>

<pallas_src>
import jax
import jax.numpy as jnp
from jax.experimental import pallas as pl
from jax.experimental.pallas import tpu as pltpu


def _mlp_kernel(x_ref, w1_ref, b1_ref, w2_ref, b2_ref, w3_ref, b3_ref, o_ref):
    # Cast the f32 activation tile to the MXU compute dtype in VMEM (cheaper
    # than a separate XLA cast pass over x in HBM).
    x = x_ref[...].astype(w1_ref.dtype)

    # ---- layer_input: x @ W1 + b1, (dropout = id), ReLU ---------------------
    h = jnp.dot(x, w1_ref[...], preferred_element_type=jnp.float32)
    h = jnp.maximum(h + b1_ref[...], 0.0)          # b1 is (1, H) -> row broadcast

    # ---- layer_hidden1: h @ W2 + b2, (dropout = id), ReLU -------------------
    h = jnp.dot(h.astype(w2_ref.dtype), w2_ref[...],
                preferred_element_type=jnp.float32)
    h = jnp.maximum(h + b2_ref[...], 0.0)

    # ---- layer_hidden2: h @ W3 + b3 -----------------------------------------
    logits = jnp.dot(h.astype(w3_ref.dtype), w3_ref[...],
                     preferred_element_type=jnp.float32)
    logits = logits + b3_ref[...]

    # ---- softmax over dim=1 (last axis of 2-D logits), numerically stable ---
    # Exact divide (not pl.reciprocal(approx=True)) so rows sum to 1 to f32
    # precision — required by downstream normalization checks.
    m = jnp.max(logits, axis=-1, keepdims=True)
    e = jnp.exp(logits - m)
    denom = jnp.sum(e, axis=-1, keepdims=True)
    o_ref[...] = (e / denom).astype(o_ref.dtype)


def _round_up(x, m):
    return ((x + m - 1) // m) * m


def _vmem_limit_bytes():
    # ~75% of this generation's physical VMEM (48 MiB on v7x, 96 MiB on
    # v5e/v6e) — leaves headroom for compiler-internal scratch.
    try:
        cap = pltpu.get_tpu_info().vmem_capacity_bytes
    except Exception:
        cap = 128 << 20
    return int(cap * 3 // 4)


def mlp_pallas(x, w1, b1, w2, b2, w3, b3, *, tile_b=512,
               compute_dtype=jnp.bfloat16):
    """x: [B, dim_in]; w_i: [in_i, out_i]; b_i: [out_i]. Returns [B, dim_out] f32."""
    B, dim_in = x.shape
    dim_out = w3.shape[1]

    # Batch tile policy:
    #  * large default (512) to amortize per-grid-step overhead at real batch
    #    sizes (multiple of 256 -> full MXU M tiles on v6e/v7x),
    #  * for small batches, size the tile so the grid has >=2 steps when the
    #    batch allows it (so v7x's second TensorCore gets work); always
    #    sublane-aligned (multiple of 8).
    if B <= tile_b:
        tile_b = max(8, _round_up(-(-B // 2), 8))
    padded_b = _round_up(B, tile_b)
    if padded_b != B:
        x = jnp.pad(x, ((0, padded_b - B), (0, 0)))

    # Weights cast to the MXU dtype once here; x stays f32 and is cast in the
    # kernel.  Biases stay f32 (added to the f32 accumulator).
    w1c = w1.astype(compute_dtype)
    w2c = w2.astype(compute_dtype)
    w3c = w3.astype(compute_dtype)
    b1_2d = b1.reshape(1, -1).astype(jnp.float32)
    b2_2d = b2.reshape(1, -1).astype(jnp.float32)
    b3_2d = b3.reshape(1, -1).astype(jnp.float32)

    # Weights/biases: full-array blocks whose index never changes -> resident
    # in VMEM across all grid steps, and single-buffered (Buffered(1)) since
    # they are DMA'd exactly once.
    resident = lambda a: pl.BlockSpec(a.shape, lambda i: (0,) * a.ndim,
                                      pipeline_mode=pl.Buffered(1))

    grid = (padded_b // tile_b,)

    out = pl.pallas_call(
        _mlp_kernel,
        out_shape=jax.ShapeDtypeStruct((padded_b, dim_out), jnp.float32),
        grid_spec=pltpu.PrefetchScalarGridSpec(
            num_scalar_prefetch=0,
            grid=grid,
            in_specs=[
                pl.BlockSpec((tile_b, dim_in), lambda i: (i, 0)),  # x tile (pipelined)
                resident(w1c), resident(b1_2d),
                resident(w2c), resident(b2_2d),
                resident(w3c), resident(b3_2d),
            ],
            out_specs=pl.BlockSpec((tile_b, dim_out), lambda i: (i, 0)),
        ),
        compiler_params=pltpu.CompilerParams(
            dimension_semantics=("parallel",),   # shard batch across TCs on v7x
            vmem_limit_bytes=_vmem_limit_bytes(),
        ),
        # TODO(synk): if dim_hidden grows so that single-buffered bf16 weights
        # + double-buffered x/out tiles + f32 intermediates exceed ~48 MiB
        # (v7x), add a K-tiling grid axis ("arbitrary") with a pl.when(k==0)
        # zero-init f32 accumulator scratch instead of whole-weights-resident.
    )(x, w1c, b1_2d, w2c, b2_2d, w3c, b3_2d)

    if padded_b != B:
        out = out[:B]
    return out


def init_params(key, dim_in, dim_hidden, dim_out):
    """Deterministic init mimicking nn.Linear's U(-1/sqrt(fan_in), 1/sqrt(fan_in)).
    Weights are stored as [in, out] (transposed vs PyTorch's [out, in])."""
    ks = jax.random.split(key, 6)

    def linear(kw, kb, fan_in, fan_out):
        bound = 1.0 / jnp.sqrt(fan_in)
        w = jax.random.uniform(kw, (fan_in, fan_out), jnp.float32, -bound, bound)
        b = jax.random.uniform(kb, (fan_out,), jnp.float32, -bound, bound)
        return w, b

    w1, b1 = linear(ks[0], ks[1], dim_in, dim_hidden)
    w2, b2 = linear(ks[2], ks[3], dim_hidden, dim_hidden)
    w3, b3 = linear(ks[4], ks[5], dim_hidden, dim_out)
    return w1, b1, w2, b2, w3, b3


def mlp_ref(x, w1, b1, w2, b2, w3, b3):
    h = jnp.maximum(x @ w1 + b1, 0.0)
    h = jnp.maximum(h @ w2 + b2, 0.0)
    logits = h @ w3 + b3
    return jax.nn.softmax(logits, axis=1)


if __name__ == "__main__":
    key = jax.random.PRNGKey(0)
    k_x, k_p = jax.random.split(key)

    B, dim_in, dim_hidden, dim_out = 8, 32, 32, 16
    x = jax.random.normal(k_x, (B, dim_in), jnp.float32)
    params = init_params(k_p, dim_in, dim_hidden, dim_out)

    out = mlp_pallas(x, *params)
    out = jax.block_until_ready(out)

    ref = mlp_ref(x, *params)  # pure-f32 reference
    assert out.shape == (B, dim_out)
    # Tolerances loosened vs f32 reference because the kernel uses bf16 MXU
    # inputs (f32 accumulation).
    assert jnp.allclose(out, ref, atol=2e-2, rtol=2e-2), "mismatch vs reference"
    assert jnp.allclose(jnp.sum(out, axis=1), 1.0, atol=1e-3), "softmax rows must sum to 1"

    print("KERNEL_OK")
</pallas_src>

<mosaic_0001>
module attributes {stable_mosaic.version = 11 : i64} {
  func.func @_mlp_kernel(%arg0: i32, %arg1: memref<8x32xf32, #tpu.memory_space<vmem>>, %arg2: memref<32x32xbf16, #tpu.memory_space<vmem>>, %arg3: memref<1x32xf32, #tpu.memory_space<vmem>>, %arg4: memref<32x32xbf16, #tpu.memory_space<vmem>>, %arg5: memref<1x32xf32, #tpu.memory_space<vmem>>, %arg6: memref<32x16xbf16, #tpu.memory_space<vmem>>, %arg7: memref<1x16xf32, #tpu.memory_space<vmem>>, %arg8: memref<8x16xf32, #tpu.memory_space<vmem>>) attributes {dimension_semantics = [#tpu.dimension_semantics<parallel>], iteration_bounds = array<i64: 1>, scalar_prefetch = 0 : i64, scratch_operands = 0 : i64, tpu.core_type = #tpu.core_type<tc>, window_params = [{transform_indices = @transform_0, window_bounds = array<i64: 8, 32>}, {pipeline_mode = #tpu.pipeline_mode<synchronous>, transform_indices = @transform_1, window_bounds = array<i64: 32, 32>}, {pipeline_mode = #tpu.pipeline_mode<synchronous>, transform_indices = @transform_2, window_bounds = array<i64: 1, 32>}, {pipeline_mode = #tpu.pipeline_mode<synchronous>, transform_indices = @transform_3, window_bounds = array<i64: 32, 32>}, {pipeline_mode = #tpu.pipeline_mode<synchronous>, transform_indices = @transform_4, window_bounds = array<i64: 1, 32>}, {pipeline_mode = #tpu.pipeline_mode<synchronous>, transform_indices = @transform_5, window_bounds = array<i64: 32, 16>}, {pipeline_mode = #tpu.pipeline_mode<synchronous>, transform_indices = @transform_6, window_bounds = array<i64: 1, 16>}, {transform_indices = @transform_7, window_bounds = array<i64: 8, 16>}]} {
    %c0 = arith.constant 0 : index
    %c0_0 = arith.constant 0 : index
    %0 = vector.load %arg1[%c0, %c0_0] : memref<8x32xf32, #tpu.memory_space<vmem>>, vector<8x32xf32>
    %1 = arith.truncf %0 : vector<8x32xf32> to vector<8x32xbf16>
    %c0_1 = arith.constant 0 : index
    %c0_2 = arith.constant 0 : index
    %2 = vector.load %arg2[%c0_1, %c0_2] : memref<32x32xbf16, #tpu.memory_space<vmem>>, vector<32x32xbf16>
    %cst = arith.constant dense<0.000000e+00> : vector<8x32xf32>
    %3 = tpu.matmul %1, %2, %cst {dimension_numbers = #tpu.dot_dimension_numbers<[1], [0], [0], [1], [0, 0, 1, 1], [], []>} : vector<8x32xbf16>, vector<32x32xbf16>, vector<8x32xf32> -> vector<8x32xf32>
    %c0_3 = arith.constant 0 : index
    %c0_4 = arith.constant 0 : index
    %4 = vector.load %arg3[%c0_3, %c0_4] : memref<1x32xf32, #tpu.memory_space<vmem>>, vector<1x32xf32>
    %5 = vector.broadcast %4 : vector<1x32xf32> to vector<8x32xf32>
    %6 = arith.addf %3, %5 : vector<8x32xf32>
    %cst_5 = arith.constant 0.000000e+00 : f32
    %7 = vector.broadcast %cst_5 : f32 to vector<8x32xf32>
    %8 = arith.maximumf %6, %7 : vector<8x32xf32>
    %9 = arith.truncf %8 : vector<8x32xf32> to vector<8x32xbf16>
    %c0_6 = arith.constant 0 : index
    %c0_7 = arith.constant 0 : index
    %10 = vector.load %arg4[%c0_6, %c0_7] : memref<32x32xbf16, #tpu.memory_space<vmem>>, vector<32x32xbf16>
    %cst_8 = arith.constant dense<0.000000e+00> : vector<8x32xf32>
    %11 = tpu.matmul %9, %10, %cst_8 {dimension_numbers = #tpu.dot_dimension_numbers<[1], [0], [0], [1], [0, 0, 1, 1], [], []>} : vector<8x32xbf16>, vector<32x32xbf16>, vector<8x32xf32> -> vector<8x32xf32>
    %c0_9 = arith.constant 0 : index
    %c0_10 = arith.constant 0 : index
    %12 = vector.load %arg5[%c0_9, %c0_10] : memref<1x32xf32, #tpu.memory_space<vmem>>, vector<1x32xf32>
    %13 = vector.broadcast %12 : vector<1x32xf32> to vector<8x32xf32>
    %14 = arith.addf %11, %13 : vector<8x32xf32>
    %cst_11 = arith.constant 0.000000e+00 : f32
    %15 = vector.broadcast %cst_11 : f32 to vector<8x32xf32>
    %16 = arith.maximumf %14, %15 : vector<8x32xf32>
    %17 = arith.truncf %16 : vector<8x32xf32> to vector<8x32xbf16>
    %c0_12 = arith.constant 0 : index
    %c0_13 = arith.constant 0 : index
    %18 = vector.load %arg6[%c0_12, %c0_13] : memref<32x16xbf16, #tpu.memory_space<vmem>>, vector<32x16xbf16>
    %cst_14 = arith.constant dense<0.000000e+00> : vector<8x16xf32>
    %19 = tpu.matmul %17, %18, %cst_14 {dimension_numbers = #tpu.dot_dimension_numbers<[1], [0], [0], [1], [0, 0, 1, 1], [], []>} : vector<8x32xbf16>, vector<32x16xbf16>, vector<8x16xf32> -> vector<8x16xf32>
    %c0_15 = arith.constant 0 : index
    %c0_16 = arith.constant 0 : index
    %20 = vector.load %arg7[%c0_15, %c0_16] : memref<1x16xf32, #tpu.memory_space<vmem>>, vector<1x16xf32>
    %21 = vector.broadcast %20 : vector<1x16xf32> to vector<8x16xf32>
    %22 = arith.addf %19, %21 : vector<8x16xf32>
    %cst_17 = arith.constant dense<0xFF800000> : vector<8xf32>
    %23 = vector.multi_reduction <maximumf>, %22, %cst_17 [1] : vector<8x16xf32> to vector<8xf32>
    %24 = vector.shape_cast %23 : vector<8xf32> to vector<8x1xf32>
    %25 = vector.broadcast %24 : vector<8x1xf32> to vector<8x16xf32>
    %26 = arith.subf %22, %25 : vector<8x16xf32>
    %27 = math.exp %26 : vector<8x16xf32>
    %cst_18 = arith.constant dense<0.000000e+00> : vector<8xf32>
    %28 = vector.multi_reduction <add>, %27, %cst_18 [1] : vector<8x16xf32> to vector<8xf32>
    %29 = vector.shape_cast %28 : vector<8xf32> to vector<8x1xf32>
    %30 = vector.broadcast %29 : vector<8x1xf32> to vector<8x16xf32>
    %31 = arith.divf %27, %30 : vector<8x16xf32>
    %c0_19 = arith.constant 0 : index
    %c0_20 = arith.constant 0 : index
    %32 = vector.load %arg8[%c0_19, %c0_20] : memref<8x16xf32, #tpu.memory_space<vmem>>, vector<8x16xf32>
    tpu.vector_store %arg8[%c0_19, %c0_20], %31 {strides = array<i32>} : memref<8x16xf32, #tpu.memory_space<vmem>>, vector<8x16xf32>,
    return
  }
  func.func @transform_0(%arg0: i32) -> (i32, i32) {
    %c0_i32 = arith.constant 0 : i32
    %c0_i32_0 = arith.constant 0 : i32
    return %arg0, %c0_i32 : i32, i32
  }
  func.func @transform_1(%arg0: i32) -> (i32, i32) {
    %c0_i32 = arith.constant 0 : i32
    %c0_i32_0 = arith.constant 0 : i32
    %c0_i32_1 = arith.constant 0 : i32
    return %c0_i32, %c0_i32_0 : i32, i32
  }
  func.func @transform_2(%arg0: i32) -> (i32, i32) {
    %c0_i32 = arith.constant 0 : i32
    %c0_i32_0 = arith.constant 0 : i32
    %c0_i32_1 = arith.constant 0 : i32
    return %c0_i32, %c0_i32_0 : i32, i32
  }
  func.func @transform_3(%arg0: i32) -> (i32, i32) {
    %c0_i32 = arith.constant 0 : i32
    %c0_i32_0 = arith.constant 0 : i32
    %c0_i32_1 = arith.constant 0 : i32
    return %c0_i32, %c0_i32_0 : i32, i32
  }
  func.func @transform_4(%arg0: i32) -> (i32, i32) {
    %c0_i32 = arith.constant 0 : i32
    %c0_i32_0 = arith.constant 0 : i32
    %c0_i32_1 = arith.constant 0 : i32
    return %c0_i32, %c0_i32_0 : i32, i32
  }
  func.func @transform_5(%arg0: i32) -> (i32, i32) {
    %c0_i32 = arith.constant 0 : i32
    %c0_i32_0 = arith.constant 0 : i32
    %c0_i32_1 = arith.constant 0 : i32
    return %c0_i32, %c0_i32_0 : i32, i32
  }
  func.func @transform_6(%arg0: i32) -> (i32, i32) {
    %c0_i32 = arith.constant 0 : i32
    %c0_i32_0 = arith.constant 0 : i32
    %c0_i32_1 = arith.constant 0 : i32
    return %c0_i32, %c0_i32_0 : i32, i32
  }
  func.func @transform_7(%arg0: i32) -> (i32, i32) {
    %c0_i32 = arith.constant 0 : i32
    %c0_i32_0 = arith.constant 0 : i32
    return %arg0, %c0_i32 : i32, i32
  }
}

</mosaic_0001>

<bundles_post_ra>
// kernel: tpu_custom_call.1
= control target key start
LH: loop header
LB: loop body
LE: loop exit
PB: predicated region body
PF: predicated region fallthrough
CT: control target
= control target key end

     0   :  { %12 = vsyncpa [#allocation3], 0  ;;  %s767_s0 = inlined_call_operand.hbm [shape: f32[8,32], index: 0, kind: input, shape index: {}]   ;;  %s768_s1 = inlined_call_operand.hbm [shape: bf16[32,32], index: 1, kind: input, shape index: {}]   ;;  %s769_s2 = inlined_call_operand.hbm [shape: f32[1,32], index: 2, kind: input, shape index: {}]   ;;  %s770_s3 = inlined_call_operand.hbm [shape: bf16[32,32], index: 3, kind: input, shape index: {}]   ;;  %s771_s4 = inlined_call_operand.hbm [shape: f32[1,32], index: 4, kind: input, shape index: {}]   ;;  %s772_s5 = inlined_call_operand.hbm [shape: bf16[32,16], index: 5, kind: input, shape index: {}]   ;;  %s773_s6 = inlined_call_operand.hbm [shape: f32[1,16], index: 6, kind: input, shape index: {}]   ;;  %s774_s7 = inlined_call_operand.hbm [shape: f32[8,16], index: 7, kind: output, shape index: {}]  }
   0x1   :  { %13 = vsyncpa [#allocation6], 0 }
   0x2   :  { %14 = vsyncpa [#allocation9], 0 }
   0x3   :  { %15 = vsyncpa [#allocation12], 0 }
   0x4   :  { %16 = vsyncpa [#allocation4], 0  ;;  %s604_s24 = smov [#allocation5]   ;;  %s418_s28 = scalar_lea.hbm %s768_s1, 256 }
   0x5   :  { %s32_s25 = sshll.u32 %s604_s24, 4  ;;  %p419_p0 = scmp.ne.s32.totalorder %s768_s1, %s418_s28  ;;  %s33_s25 = int_to_ptr.vmem [resolvable:$true] %s32_s25 }
   0x6   :  { %p422_p1 = scmp.lt.u32.totalorder %s418_s28, %s768_s1 }
   0x8   :  { %p424_p2 = pnand %p422_p1, %p419_p0 }
   0xa   :  { %427 = shalt.err (!%p424_p2)
}
   0xb   :  { %s428_s10 = scalar_lea.vmem %s33_s25, 256  ;;  %p433_p4 = scmp.lt.s32.totalorder %s33_s25, %s33_s25 }
   0xc   :  { %p429_p3 = scmp.ne.s32.totalorder %s33_s25, %s428_s10  ;;  %p434_p5 = scmp.lt.s32.totalorder %s428_s10, %s428_s10 }
   0xe   :  { %p435_p6 = por %p434_p5, %p433_p4 }
  0x10   :  { %p436_p7 = pnand %p435_p6, %p429_p3 }
  0x12   :  { %439 = shalt.err (!%p436_p7)
}
  0x13   :  { %s605_s11 = smov 64   ;;  %s606_s12 = smov 4  }
  0x14   :  { %38 = dma.hbm_to_vmem [thread:$0]  %s768_s1, 256, %s33_s25, [#allocation6], %s605_s11, %s605_s11, %s606_s12  }
  0x15   :  { %s607_s15 = smov [#allocation8]   ;;  %s608_s17 = smov [#allocation11]  }
  0x16   :  { %s54_s16 = sshll.u32 %s607_s15, 4  ;;  %s76_s18 = sshll.u32 %s608_s17, 4  ;;  %s55_s16 = int_to_ptr.vmem [resolvable:$true] %s54_s16  ;;  %s77_s18 = int_to_ptr.vmem [resolvable:$true] %s76_s18 }
  0x17   :  { %s440_s21 = scalar_lea.hbm %s770_s3, 256 }
  0x18   :  { %p441_p8 = scmp.ne.s32.totalorder %s770_s3, %s440_s21  ;;  %p444_p9 = scmp.lt.u32.totalorder %s440_s21, %s770_s3 }
  0x1a   :  { %p446_p10 = pnand %p444_p9, %p441_p8 }
  0x1c   :  { %449 = shalt.err (!%p446_p10)
}
  0x1d   :  { %s450_s1 = scalar_lea.vmem %s55_s16, 256  ;;  %p455_p12 = scmp.lt.s32.totalorder %s55_s16, %s55_s16 }
  0x1e   :  { %p451_p11 = scmp.ne.s32.totalorder %s55_s16, %s450_s1  ;;  %p456_p13 = scmp.lt.s32.totalorder %s450_s1, %s450_s1 }
  0x20   :  { %p457_p0 = por %p456_p13, %p455_p12 }
  0x22   :  { %p458_p1 = pnand %p457_p0, %p451_p11 }
  0x24   :  { %461 = shalt.err (!%p458_p1)
}
  0x25   :  { %60 = dma.hbm_to_vmem [thread:$0]  %s770_s3, 256, %s55_s16, [#allocation9], %s605_s11, %s605_s11, %s606_s12  }
  0x26   :  { %s462_s30 = scalar_lea.hbm %s772_s5, 256 }
  0x27   :  { %p463_p2 = scmp.ne.s32.totalorder %s772_s5, %s462_s30  ;;  %p466_p3 = scmp.lt.u32.totalorder %s462_s30, %s772_s5 }
  0x29   :  { %p468_p4 = pnand %p466_p3, %p463_p2 }
  0x2b   :  { %471 = shalt.err (!%p468_p4)
}
  0x2c   :  { %s472_s14 = scalar_lea.vmem %s77_s18, 256  ;;  %p477_p6 = scmp.lt.s32.totalorder %s77_s18, %s77_s18 }
  0x2d   :  { %p473_p5 = scmp.ne.s32.totalorder %s77_s18, %s472_s14  ;;  %p478_p7 = scmp.lt.s32.totalorder %s472_s14, %s472_s14 }
  0x2f   :  { %p479_p8 = por %p478_p7, %p477_p6 }
  0x31   :  { %p480_p9 = pnand %p479_p8, %p473_p5 }
  0x33   :  { %483 = shalt.err (!%p480_p9)
}
  0x34   :  { %82 = dma.hbm_to_vmem [thread:$0]  %s772_s5, 256, %s77_s18, [#allocation12], %s605_s11, %s605_s11, %s606_s12  }
  0x35   :  { %s609_s16 = smov [#allocation2]   ;;  %s610_s19 = smov [#allocation7]  }
  0x36   :  { %s23_s17 = sshll.u32 %s609_s16, 4  ;;  %s45_s20 = sshll.u32 %s610_s19, 4  ;;  %s24_s17 = int_to_ptr.vmem [resolvable:$true] %s23_s17  ;;  %s46_s20 = int_to_ptr.vmem [resolvable:$true] %s45_s20 }
  0x37   :  { %s484_s23 = scalar_lea.hbm %s767_s0, 128 }
  0x38   :  { %p485_p10 = scmp.ne.s32.totalorder %s767_s0, %s484_s23  ;;  %p488_p11 = scmp.lt.u32.totalorder %s484_s23, %s767_s0 }
  0x3a   :  { %p490_p12 = pnand %p488_p11, %p485_p10 }
  0x3c   :  { %493 = shalt.err (!%p490_p12)
}
  0x3d   :  { %s494_s5 = scalar_lea.vmem %s24_s17, 128  ;;  %p499_p0 = scmp.lt.s32.totalorder %s24_s17, %s24_s17 }
  0x3e   :  { %p495_p13 = scmp.ne.s32.totalorder %s24_s17, %s494_s5  ;;  %p500_p1 = scmp.lt.s32.totalorder %s494_s5, %s494_s5 }
  0x40   :  { %p501_p2 = por %p500_p1, %p499_p0 }
  0x42   :  { %p502_p3 = pnand %p501_p2, %p495_p13 }
  0x44   :  { %505 = shalt.err (!%p502_p3)
}
  0x45   :  { %26 = dma.hbm_to_vmem [thread:$0]  %s767_s0, 128, %s24_s17, [#allocation3]  }
  0x46   :  { %s506_s28 = scalar_lea.hbm %s769_s2, 16 }
  0x47   :  { %p507_p4 = scmp.ne.s32.totalorder %s769_s2, %s506_s28  ;;  %p510_p5 = scmp.lt.u32.totalorder %s506_s28, %s769_s2 }
  0x49   :  { %p512_p6 = pnand %p510_p5, %p507_p4 }
  0x4b   :  { %515 = shalt.err (!%p512_p6)
}
  0x4c   :  { %s516_s10 = scalar_lea.vmem %s46_s20, 16  ;;  %s520_s13 = scalar_lea.vmem %s46_s20, 32 }
  0x4d   :  { %p517_p7 = scmp.ne.s32.totalorder %s46_s20, %s516_s10  ;;  %p521_p8 = scmp.lt.s32.totalorder %s46_s20, %s46_s20 }
  0x4e   :  { %p522_p9 = scmp.lt.s32.totalorder %s520_s13, %s516_s10 }
  0x50   :  { %p523_p10 = por %p522_p9, %p521_p8 }
  0x52   :  { %p524_p11 = pnand %p523_p10, %p517_p7 }
  0x54   :  { %527 = shalt.err (!%p524_p11)
}
  0x55   :  { %48 = dma.hbm_to_vmem [thread:$0]  %s769_s2, 16, %s46_s20, [#allocation6]  }
  0x56   :  { %s611_s3 = smov [#allocation10]   ;;  %s612_s16 = smov [#allocation13]  }
  0x57   :  { %s67_s15 = sshll.u32 %s611_s3, 4  ;;  %s89_s17 = sshll.u32 %s612_s16, 4  ;;  %s68_s15 = int_to_ptr.vmem [resolvable:$true] %s67_s15  ;;  %s90_s17 = int_to_ptr.vmem [resolvable:$true] %s89_s17 }
  0x58   :  { %s528_s22 = scalar_lea.hbm %s771_s4, 16 }
  0x59   :  { %p529_p12 = scmp.ne.s32.totalorder %s771_s4, %s528_s22  ;;  %p532_p13 = scmp.lt.u32.totalorder %s528_s22, %s771_s4 }
  0x5b   :  { %p534_p0 = pnand %p532_p13, %p529_p12 }
  0x5d   :  { %537 = shalt.err (!%p534_p0)
}
  0x5e   :  { %s538_s2 = scalar_lea.vmem %s68_s15, 16  ;;  %s542_s20 = scalar_lea.vmem %s68_s15, 32 }
  0x5f   :  { %p539_p1 = scmp.ne.s32.totalorder %s68_s15, %s538_s2  ;;  %p543_p2 = scmp.lt.s32.totalorder %s68_s15, %s68_s15 }
  0x60   :  { %p544_p3 = scmp.lt.s32.totalorder %s542_s20, %s538_s2 }
  0x62   :  { %p545_p4 = por %p544_p3, %p543_p2 }
  0x64   :  { %p546_p5 = pnand %p545_p4, %p539_p1 }
  0x66   :  { %549 = shalt.err (!%p546_p5)
}
  0x67   :  { %70 = dma.hbm_to_vmem [thread:$0]  %s771_s4, 16, %s68_s15, [#allocation9]  }
  0x68   :  { %s550_s18 = scalar_lea.hbm %s773_s6, 16 }
  0x69   :  { %p551_p6 = scmp.ne.s32.totalorder %s773_s6, %s550_s18  ;;  %p554_p7 = scmp.lt.u32.totalorder %s550_s18, %s773_s6 }
  0x6b   :  { %p556_p8 = pnand %p554_p7, %p551_p6 }
  0x6d   :  { %559 = shalt.err (!%p556_p8)
}
  0x6e   :  { %s560_s8 = scalar_lea.vmem %s90_s17, 16  ;;  %s564_s9 = scalar_lea.vmem %s90_s17, 32 }
  0x6f   :  { %p561_p9 = scmp.ne.s32.totalorder %s90_s17, %s560_s8  ;;  %p565_p10 = scmp.lt.s32.totalorder %s90_s17, %s90_s17 }
  0x70   :  { %p566_p11 = scmp.lt.s32.totalorder %s564_s9, %s560_s8 }
  0x72   :  { %p567_p12 = por %p566_p11, %p565_p10 }
  0x74   :  { %p568_p13 = pnand %p567_p12, %p561_p9 }
  0x76   :  { %571 = shalt.err (!%p568_p13)
}
  0x77   :  { %92 = dma.hbm_to_vmem [thread:$0]  %s773_s6, 16, %s90_s17, [#allocation12]  }
  0x78   :  { %594 = dma.done.wait [#allocation3], 128  }
  0x79   :  { %595 = vsyncadd [#allocation3], 4294967168 }
  0x7a   :  { %596 = dma.done.wait [#allocation6], 272  }
  0x7b   :  { %597 = vsyncadd [#allocation6], 4294967024 }
  0x7c   :  { %598 = dma.done.wait [#allocation9], 272  }
  0x7d   :  { %599 = vsyncadd [#allocation9], 4294967024 }
  0x7e   :  { %600 = dma.done.wait [#allocation12], 272  }
  0x7f   :  { %601 = vsyncadd [#allocation12], 4294967024  ;;  %v613_v0 = vmov 0.0   ;;  %vm614_vm0 = vmmov 0   ;;  %v408_v1 = vld [vmem:[#allocation5] sm:$0xff]   ;;  %v409_v2 = vld [vmem:[#allocation5 + $0x8] sm:$0xff]  }
  0x80   :  { %372 = vmatprep.subr.bf16.mxu0 %v613_v0  ;;  %376 = vmatprep.mubr.msk.bf16.mxu0 %vm614_vm0, %v613_v0  ;;  %v115_v3 = vld [vmem:[#allocation2] sm:$0xff]  ;;  %vm140_vm1 = vcmask 261120   ;;  %v412_v7 = vld [vmem:[#allocation11] sm:$0xff]   ;;  %v351_v8 = vld [vmem:[#allocation7] ss:$0 sm:$0xff]  ;;  %vm320_vm2 = vcmask 130048  }
  0x81   :  { %380 = vmatprep.subr.bf16.mxu1 %v613_v0  ;;  %384 = vmatprep.mubr.msk.bf16.mxu1 %vm614_vm0, %v613_v0  ;;  %v116_v4 = vpack.c.bf16 %v115_v3, %v115_v3  ;;  %v410_v5 = vld [vmem:[#allocation8] sm:$0xff]   ;;  %v411_v6 = vld [vmem:[#allocation8 + $0x8] sm:$0xff]   ;;  %v355_v17 = vld [vmem:[#allocation10] ss:$0 sm:$0xff]  ;;  %s615_s6 = smov [#allocation14]  }
  0x82   :  { %373 = vmatpush3.bf16.msra.mxu0 %v408_v1  ;;  %381 = vmatpush3.bf16.msra.mxu1 %v410_v5  ;;  %v413_v16 = vld [vmem:[#allocation11 + $0x8] sm:$0xff]   ;;  %v359_v25 = vld [vmem:[#allocation13] ss:$0 sm:$0xff]  ;;  %s339_s13 = sshll.u32 %s615_s6, 4  ;;  %s340_s13 = int_to_ptr.vmem [resolvable:$true] %s339_s13 }
  0x83   :  { %374 = vmatprep.subr.bf16.mxu0 %v613_v0  ;;  %382 = vmatprep.subr.bf16.mxu1 %v613_v0  ;;  %s572_s0 = scalar_lea.vmem %s340_s13, 128  ;;  %p577_p1 = scmp.lt.s32.totalorder %s340_s13, %s340_s13 }
  0x84   :  { %p573_p0 = scmp.ne.s32.totalorder %s340_s13, %s572_s0  ;;  %p578_p2 = scmp.lt.s32.totalorder %s572_s0, %s572_s0 }
  0x86   :  { %375 = vmatpush3.bf16.msra.mxu0 %v409_v2  ;;  %383 = vmatpush3.bf16.msra.mxu1 %v411_v6  ;;  %p579_p3 = por %p578_p2, %p577_p1 }
  0x87   :  { %388 = vmatprep.subr.bf16.mxu0 %v613_v0 }
  0x88   :  { %p580_p4 = pnand %p579_p3, %p573_p0 }
  0x89   :  { %377 = vmatmul.mubr.msk.bf16.vlgmr.msra.gmra.mrb[0].mxu0 %vm140_vm1, %v116_v4 }
  0x8a   :  { %392 = vmatprep.mubr.msk.bf16.mxu0 %vm614_vm0, %v613_v0  ;;  %389 = vmatpush3.bf16.msra.mxu0 %v412_v7 }
  0x8b   :  { %390 = vmatprep.subr.bf16.mxu0 %v613_v0 }
  0x8e   :  { %391 = vmatpush3.bf16.msra.mxu0 %v413_v16 }
 0x15c   :  { %v178_v9 = vpop.f32.mrb[0].mxu0 }
 0x15d   :  { %v179_v10 = vadd.f32 %v351_v8, %v178_v9  ;;  %v378_v11 = vpop.f32.mrb[1].mxu0 }
 0x15e   :  { %v181_v12 = vpop.f32.mrb[2].mxu0 }
 0x15f   :  { %v184_v13 = vmax.f32 %v179_v10, 0.0  ;;  %v379_v14 = vpop.f32.mrb[3].mxu0 }
 0x161   :  { %v185_v15 = vpack.c.bf16 %v184_v13, %v184_v13 }
 0x163   :  { %385 = vmatmul.mubr.msk.bf16.vlgmr.msra.gmra.mrb[0].mxu1 %vm140_vm1, %v185_v15 }
 0x236   :  { %v246_v18 = vpop.f32.mrb[0].mxu1 }
 0x237   :  { %v247_v19 = vadd.f32 %v355_v17, %v246_v18  ;;  %v386_v20 = vpop.f32.mrb[1].mxu1 }
 0x238   :  { %v249_v21 = vpop.f32.mrb[2].mxu1 }
 0x239   :  { %v252_v22 = vmax.f32 %v247_v19, 0.0  ;;  %v387_v23 = vpop.f32.mrb[3].mxu1 }
 0x23b   :  { %v253_v24 = vpack.c.bf16 %v252_v22, %v252_v22 }
 0x23d   :  { %393 = vmatmul.mubr.msk.bf16.vlgmr.msra.gmra.mrb[4].mxu0 %vm140_vm1, %v253_v24 }
 0x310   :  { %v314_v26 = vpop.f32.mrb[4].mxu0 }
 0x311   :  { %v315_v27 = vadd.f32 %v359_v25, %v314_v26  ;;  %v394_v28 = vpop.f32.mrb[5].mxu0 }
 0x312   :  { %v317_v29 = vpop.f32.mrb[6].mxu0 }
 0x313   :  { %v395_v30 = vpop.f32.mrb[7].mxu0  ;;  %v321_v31 = vsel %vm320_vm2, %v315_v27, -inf }
 0x314   :  { %322 = vmax.xlane.f32.xlu0 %v321_v31 }
 0x3a1   :  { %v323_v32 = vpop.xlane.xlu0 %322 }
 0x3a2   :  { %v324_v33 = vsub.f32 %v315_v27, %v323_v32 }
 0x3a4   :  { %v325_v34 = vmul.f32 1.442695, %v324_v33 }
 0x3a6   :  { %414 = vpow2.f32 %v325_v34 }
 0x3b0   :  { %v415_v35 = vpop.eup %414 }
 0x3b1   :  { %v327_v36 = vsel %vm320_vm2, %v415_v35, 0.0 }
 0x3b2   :  { %328 = vadd.xlane.f32.xlu0 %v327_v36 }
 0x43f   :  { %v329_v37 = vpop.xlane.xlu0 %328 }
 0x440   :  { %416 = vrcp.f32 %v329_v37 }
 0x44a   :  { %v417_v38 = vpop.eup %416 }
 0x44b   :  { %v331_v39 = vmul.f32 %v417_v38, %v415_v35 }
 0x44d   :  { %332 = vst.msk [vmem:[#allocation14] sm:$0xff] %vm320_vm2, %v331_v39 }
 0x44e   :  { %583 = shalt.err (!%p580_p4)
}
 0x44f   :  { %s584_s15 = scalar_lea.hbm %s774_s7, 128 }
 0x450   :  { %p585_p5 = scmp.ne.s32.totalorder %s774_s7, %s584_s15  ;;  %p588_p6 = scmp.lt.u32.totalorder %s584_s15, %s774_s7 }
 0x452   :  { %p590_p7 = pnand %p588_p6, %p585_p5 }
 0x454   :  { %593 = shalt.err (!%p590_p7)
}
 0x455   :  { %342 = dma.vmem_to_hbm [thread:$0]  %s340_s13, 128, %s774_s7, [#allocation4]  }
 0x456   :  { %602 = dma.done.wait [#allocation4], 128  }
 0x457   :  { %603 = vsyncadd [#allocation4], 4294967168 }
 0x458   :  { %346 = vsyncpa [#allocation3], 1 }
 0x459   :  { %347 = vsyncpa [#allocation6], 1 }
 0x45a   :  { %348 = vsyncpa [#allocation9], 1 }
 0x45b   :  { %349 = vsyncpa [#allocation12], 1 }
 0x45c   :  { %350 = vsyncpa [#allocation4], 1 }

</bundles_post_ra>
